<compile_context>
chip_gen: v7x
topology: tpu7x:2x2x1
jax: 0.10.0
libtpu: 0.0.40
codegen_flags: <defaults>
</compile_context>

<pallas_src>
import functools
import math

import jax
import jax.numpy as jnp
from jax.experimental import pallas as pl
from jax.experimental.pallas import tpu as pltpu

_SQRT_2_OVER_PI = math.sqrt(2.0 / math.pi)
_GELU_C2 = 0.044715 * _SQRT_2_OVER_PI


def _gelu_tanh(x):
    # torch.nn.GELU(approximate='tanh'), strength-reduced:
    #   0.5*x*(1 + tanh(c*(x + 0.044715*x^3)))
    #   == 0.5*x + 0.5*x*tanh(x*(c + 0.044715*c*x*x))
    x_sq = x * x
    inner = x * (_SQRT_2_OVER_PI + _GELU_C2 * x_sq)
    return 0.5 * x + 0.5 * x * jnp.tanh(inner)


def _round_up(v, m):
    return ((v + m - 1) // m) * m


def _pick_tile(dim, preferred):
    for t in preferred:
        if dim % t == 0:
            return t
    return dim


def _vmem_capacity_bytes():
    try:
        return int(pltpu.get_tpu_info().vmem_capacity_bytes)
    except Exception:
        return 64 * 1024 * 1024  # conservative: v7x per-TensorCore VMEM


# ----------------------------------------------------------------------------
# Kernels
# ----------------------------------------------------------------------------
def _mlp_kernel_resident(x_ref, w1_ref, b1_ref, w2_ref, b2_ref, o_ref, *,
                         ew_dtype):
    # Weights held resident in VMEM; single full-width pass over H.
    h = jnp.dot(x_ref[...], w1_ref[...], preferred_element_type=jnp.float32)
    h = h.astype(ew_dtype) + b1_ref[...].astype(ew_dtype)
    g = _gelu_tanh(h)
    out = jnp.dot(g.astype(w2_ref.dtype), w2_ref[...],
                  preferred_element_type=jnp.float32)
    out = out + b2_ref[...].astype(jnp.float32)
    o_ref[...] = out.astype(o_ref.dtype)


def _mlp_kernel_streamed(x_ref, w1_ref, b1_ref, w2_ref, b2_ref, o_ref,
                         acc_ref, *, ew_dtype):
    # x_ref  : (tm, C)   input row tile (native dtype)
    # w1_ref : (C, th)   c_fc weight slab
    # b1_ref : (1, th)   c_fc bias slab
    # w2_ref : (th, C)   c_proj weight slab
    # b2_ref : (1, C)    c_proj bias (tiny, full width)
    # acc_ref: (tm, C)   f32 accumulator, resident across the H reduction axis
    j = pl.program_id(1)

    @pl.when(j == 0)
    def _init():
        # Fold c_proj bias into the accumulator init (added exactly once).
        acc_ref[...] = jnp.broadcast_to(
            b2_ref[...].astype(jnp.float32), acc_ref.shape)

    h = jnp.dot(x_ref[...], w1_ref[...], preferred_element_type=jnp.float32)
    h = h.astype(ew_dtype) + b1_ref[...].astype(ew_dtype)
    g = _gelu_tanh(h)
    acc_ref[...] += jnp.dot(g.astype(w2_ref.dtype), w2_ref[...],
                            preferred_element_type=jnp.float32)

    @pl.when(j == pl.num_programs(1) - 1)
    def _finalize():
        o_ref[...] = acc_ref[...].astype(o_ref.dtype)


# ----------------------------------------------------------------------------
# Wrapper
# ----------------------------------------------------------------------------
def mlp_forward(x, w_fc, b_fc, w_proj, b_proj, *, tm=None, th=None,
                weights_resident=None, matmul_dtype=None):
    """x: (B, T, C). w_fc: (C, 4C), b_fc: (4C,), w_proj: (4C, C), b_proj: (C,)."""
    B, T, C = x.shape
    H = w_fc.shape[1]
    assert w_fc.shape == (C, H) and w_proj.shape == (H, C)
    M = B * T

    if matmul_dtype is not None:
        # Optional: run f32-stored models on the bf16 MXU path (3-8x MXU
        # throughput on all generations).  Changes numerics; off by default.
        x = x.astype(matmul_dtype)
        w_fc = w_fc.astype(matmul_dtype)
        b_fc = b_fc.astype(matmul_dtype)
        w_proj = w_proj.astype(matmul_dtype)
        b_proj = b_proj.astype(matmul_dtype)

    out_dtype = x.dtype
    act_itemsize = jnp.dtype(x.dtype).itemsize
    w_itemsize = jnp.dtype(w_fc.dtype).itemsize

    vmem_cap = _vmem_capacity_bytes()

    # Row tile: large enough to be AI/MXU-bound; sized per generation's VMEM
    # (1024 on 128 MiB parts = v5e/v6e, 512 on 64 MiB parts = v7x).  Pad M up
    # to a multiple of tm instead of shrinking the tile.
    if tm is None:
        tm = 1024 if vmem_cap >= 100 * 1024 * 1024 else 512
    tm = min(tm, _round_up(M, 8))
    tm = max(8, _round_up(tm, 8))
    m_pad = _round_up(M, tm)
    grid_m = m_pad // tm

    # Elementwise (bias-add + GELU) dtype: bf16 for bf16 models (v6e/v7x
    # bf16 VPU/EUP path), f32 otherwise.
    ew_dtype = jnp.bfloat16 if x.dtype == jnp.bfloat16 else jnp.float32

    # Weights-resident fast path when both weight matrices (+biases) and the
    # per-row-tile activation working set comfortably fit VMEM.
    weight_bytes = (2 * C * H + H + C) * w_itemsize
    if weights_resident is None:
        act_bytes = (4 * tm * C * act_itemsize                     # x + out, double-buffered
                     + tm * H * 4                                   # f32 result of matmul 1
                     + tm * H * jnp.dtype(ew_dtype).itemsize        # GELU intermediate
                     + tm * C * 4)                                  # f32 result of matmul 2
        weights_resident = (weight_bytes + act_bytes) <= int(0.55 * vmem_cap)

    x2 = x.reshape(M, C)
    if m_pad != M:
        x2 = jnp.pad(x2, ((0, m_pad - M), (0, 0)))
    b_fc2 = b_fc.reshape(1, H)
    b_proj2 = b_proj.reshape(1, C)

    flops = 4 * m_pad * C * H           # two matmuls, 2*M*C*H FLOPs each
    transcendentals = m_pad * H         # one tanh per hidden element
    vmem_limit = int(min(0.75 * vmem_cap, 100 * 1024 * 1024))

    if weights_resident:
        grid = (grid_m,)
        kernel = functools.partial(_mlp_kernel_resident, ew_dtype=ew_dtype)
        in_specs = [
            pl.BlockSpec((tm, C), lambda i: (i, 0)),   # x row tile
            pl.BlockSpec((C, H), lambda i: (0, 0)),    # W_fc, VMEM-resident
            pl.BlockSpec((1, H), lambda i: (0, 0)),    # b_fc, VMEM-resident
            pl.BlockSpec((H, C), lambda i: (0, 0)),    # W_proj, VMEM-resident
            pl.BlockSpec((1, C), lambda i: (0, 0)),    # b_proj, VMEM-resident
        ]
        out_specs = pl.BlockSpec((tm, C), lambda i: (i, 0))
        scratch_shapes = []
        dim_sem = ("parallel",)
        bytes_accessed = 2 * m_pad * C * act_itemsize + weight_bytes
    else:
        if th is None:
            # Multiples of 256 keep the 256x256 MXUs (v6e/v7x) full; 1024
            # halves the reduction trip count when H allows.
            th = _pick_tile(H, (1024, 512, 256, 128))
        assert H % th == 0, "hidden tile must divide H"
        grid = (grid_m, H // th)
        kernel = functools.partial(_mlp_kernel_streamed, ew_dtype=ew_dtype)
        in_specs = [
            pl.BlockSpec((tm, C), lambda i, j: (i, 0)),   # x row tile
            pl.BlockSpec((C, th), lambda i, j: (0, j)),   # W_fc slab
            pl.BlockSpec((1, th), lambda i, j: (0, j)),   # b_fc slab
            pl.BlockSpec((th, C), lambda i, j: (j, 0)),   # W_proj slab
            pl.BlockSpec((1, C), lambda i, j: (0, 0)),    # b_proj (tiny)
        ]
        out_specs = pl.BlockSpec((tm, C), lambda i, j: (i, 0))
        scratch_shapes = [pltpu.VMEM((tm, C), jnp.float32)]
        dim_sem = ("parallel", "arbitrary")
        bytes_accessed = 2 * m_pad * C * act_itemsize + grid_m * weight_bytes

    out = pl.pallas_call(
        kernel,
        out_shape=jax.ShapeDtypeStruct((m_pad, C), out_dtype),
        grid_spec=pltpu.PrefetchScalarGridSpec(
            num_scalar_prefetch=0,
            grid=grid,
            in_specs=in_specs,
            out_specs=out_specs,
            scratch_shapes=scratch_shapes,
        ),
        compiler_params=pltpu.CompilerParams(
            dimension_semantics=dim_sem,
            vmem_limit_bytes=vmem_limit,
        ),
        cost_estimate=pl.CostEstimate(
            flops=int(flops),
            transcendentals=int(transcendentals),
            bytes_accessed=int(bytes_accessed),
        ),
    )(x2, w_fc, b_fc2, w_proj, b_proj2)

    if m_pad != M:
        out = out[:M]
    return out.reshape(B, T, C)


# ----------------------------------------------------------------------------
# Init + reference + smoke test
# ----------------------------------------------------------------------------
def init_mlp_params(key, n_embd, dtype=jnp.float32):
    """Mimics torch.nn.Linear default init: U(-1/sqrt(fan_in), +1/sqrt(fan_in))."""
    h = 4 * n_embd
    k1, k2, k3, k4 = jax.random.split(key, 4)
    bound_fc = 1.0 / math.sqrt(n_embd)
    bound_pr = 1.0 / math.sqrt(h)
    # Stored as (in, out) = PyTorch weight transposed.
    w_fc = jax.random.uniform(k1, (n_embd, h), dtype, -bound_fc, bound_fc)
    b_fc = jax.random.uniform(k2, (h,), dtype, -bound_fc, bound_fc)
    w_proj = jax.random.uniform(k3, (h, n_embd), dtype, -bound_pr, bound_pr)
    b_proj = jax.random.uniform(k4, (n_embd,), dtype, -bound_pr, bound_pr)
    return w_fc, b_fc, w_proj, b_proj


def mlp_reference(x, w_fc, b_fc, w_proj, b_proj):
    h = jnp.einsum("btc,ch->bth", x, w_fc) + b_fc
    g = _gelu_tanh(h)
    return jnp.einsum("bth,hc->btc", g, w_proj) + b_proj


if __name__ == "__main__":
    # Small deterministic smoke test: n_embd=64 -> hidden=256, M = B*T = 16.
    B, T, C = 2, 8, 64
    key = jax.random.PRNGKey(0)
    kx, kp = jax.random.split(key)
    x = jax.random.normal(kx, (B, T, C), jnp.float32)
    w_fc, b_fc, w_proj, b_proj = init_mlp_params(kp, C)
    y_ref = mlp_reference(x, w_fc, b_fc, w_proj, b_proj)

    # 1) Weights-resident fast path (default for this tiny config).
    y_res = mlp_forward(x, w_fc, b_fc, w_proj, b_proj)
    y_res = jax.block_until_ready(y_res)
    assert y_res.shape == (B, T, C)
    assert jnp.allclose(y_res, y_ref, atol=1e-4, rtol=1e-4), \
        "resident path mismatch vs reference"

    # 2) Streamed path (forced), th=128 -> two hidden-dim grid steps so the
    #    f32-accumulator init / accumulate / finalize logic is exercised.
    y_str = mlp_forward(x, w_fc, b_fc, w_proj, b_proj,
                        weights_resident=False, th=128)
    y_str = jax.block_until_ready(y_str)
    assert jnp.allclose(y_str, y_ref, atol=1e-4, rtol=1e-4), \
        "streamed path mismatch vs reference"

    # 3) bf16 model: exercises the bf16 elementwise GELU path (loose tol).
    xb = x.astype(jnp.bfloat16)
    pb = tuple(p.astype(jnp.bfloat16) for p in (w_fc, b_fc, w_proj, b_proj))
    y_bf = mlp_forward(xb, *pb)
    y_bf = jax.block_until_ready(y_bf)
    assert jnp.allclose(y_bf.astype(jnp.float32), y_ref, atol=5e-2, rtol=5e-2), \
        "bf16 path mismatch vs reference"

    print("KERNEL_OK")
</pallas_src>

<mosaic_0001>
module attributes {stable_mosaic.version = 11 : i64} {
  func.func @_mlp_kernel_resident(%arg0: i32, %arg1: memref<16x64xf32, #tpu.memory_space<vmem>>, %arg2: memref<64x256xf32, #tpu.memory_space<vmem>>, %arg3: memref<1x256xf32, #tpu.memory_space<vmem>>, %arg4: memref<256x64xf32, #tpu.memory_space<vmem>>, %arg5: memref<1x64xf32, #tpu.memory_space<vmem>>, %arg6: memref<16x64xf32, #tpu.memory_space<vmem>>) attributes {dimension_semantics = [#tpu.dimension_semantics<parallel>], iteration_bounds = array<i64: 1>, scalar_prefetch = 0 : i64, scratch_operands = 0 : i64, tpu.core_type = #tpu.core_type<tc>, window_params = [{transform_indices = @transform_0, window_bounds = array<i64: 16, 64>}, {pipeline_mode = #tpu.pipeline_mode<synchronous>, transform_indices = @transform_1, window_bounds = array<i64: 64, 256>}, {pipeline_mode = #tpu.pipeline_mode<synchronous>, transform_indices = @transform_2, window_bounds = array<i64: 1, 256>}, {pipeline_mode = #tpu.pipeline_mode<synchronous>, transform_indices = @transform_3, window_bounds = array<i64: 256, 64>}, {pipeline_mode = #tpu.pipeline_mode<synchronous>, transform_indices = @transform_4, window_bounds = array<i64: 1, 64>}, {transform_indices = @transform_5, window_bounds = array<i64: 16, 64>}]} {
    %c0 = arith.constant 0 : index
    %c0_0 = arith.constant 0 : index
    %0 = vector.load %arg1[%c0, %c0_0] : memref<16x64xf32, #tpu.memory_space<vmem>>, vector<16x64xf32>
    %c0_1 = arith.constant 0 : index
    %c0_2 = arith.constant 0 : index
    %1 = vector.load %arg2[%c0_1, %c0_2] : memref<64x256xf32, #tpu.memory_space<vmem>>, vector<64x256xf32>
    %cst = arith.constant dense<0.000000e+00> : vector<16x256xf32>
    %2 = tpu.matmul %0, %1, %cst {dimension_numbers = #tpu.dot_dimension_numbers<[1], [0], [0], [1], [0, 0, 1, 1], [], []>} : vector<16x64xf32>, vector<64x256xf32>, vector<16x256xf32> -> vector<16x256xf32>
    %c0_3 = arith.constant 0 : index
    %c0_4 = arith.constant 0 : index
    %3 = vector.load %arg3[%c0_3, %c0_4] : memref<1x256xf32, #tpu.memory_space<vmem>>, vector<1x256xf32>
    %4 = vector.broadcast %3 : vector<1x256xf32> to vector<16x256xf32>
    %5 = arith.addf %2, %4 : vector<16x256xf32>
    %6 = arith.mulf %5, %5 : vector<16x256xf32>
    %cst_5 = arith.constant 0.0356774069 : f32
    %7 = vector.broadcast %cst_5 : f32 to vector<16x256xf32>
    %8 = arith.mulf %7, %6 : vector<16x256xf32>
    %cst_6 = arith.constant 0.797884583 : f32
    %9 = vector.broadcast %cst_6 : f32 to vector<16x256xf32>
    %10 = arith.addf %9, %8 : vector<16x256xf32>
    %11 = arith.mulf %5, %10 : vector<16x256xf32>
    %cst_7 = arith.constant 5.000000e-01 : f32
    %12 = vector.broadcast %cst_7 : f32 to vector<16x256xf32>
    %13 = arith.mulf %12, %5 : vector<16x256xf32>
    %cst_8 = arith.constant 5.000000e-01 : f32
    %14 = vector.broadcast %cst_8 : f32 to vector<16x256xf32>
    %15 = arith.mulf %14, %5 : vector<16x256xf32>
    %16 = math.tanh %11 : vector<16x256xf32>
    %17 = arith.mulf %15, %16 : vector<16x256xf32>
    %18 = arith.addf %13, %17 : vector<16x256xf32>
    %c0_9 = arith.constant 0 : index
    %c0_10 = arith.constant 0 : index
    %19 = vector.load %arg4[%c0_9, %c0_10] : memref<256x64xf32, #tpu.memory_space<vmem>>, vector<256x64xf32>
    %cst_11 = arith.constant dense<0.000000e+00> : vector<16x64xf32>
    %20 = tpu.matmul %18, %19, %cst_11 {dimension_numbers = #tpu.dot_dimension_numbers<[1], [0], [0], [1], [0, 0, 1, 1], [], []>} : vector<16x256xf32>, vector<256x64xf32>, vector<16x64xf32> -> vector<16x64xf32>
    %c0_12 = arith.constant 0 : index
    %c0_13 = arith.constant 0 : index
    %21 = vector.load %arg5[%c0_12, %c0_13] : memref<1x64xf32, #tpu.memory_space<vmem>>, vector<1x64xf32>
    %22 = vector.broadcast %21 : vector<1x64xf32> to vector<16x64xf32>
    %23 = arith.addf %20, %22 : vector<16x64xf32>
    %c0_14 = arith.constant 0 : index
    %c0_15 = arith.constant 0 : index
    %24 = vector.load %arg6[%c0_14, %c0_15] : memref<16x64xf32, #tpu.memory_space<vmem>>, vector<16x64xf32>
    tpu.vector_store %arg6[%c0_14, %c0_15], %23 {strides = array<i32>} : memref<16x64xf32, #tpu.memory_space<vmem>>, vector<16x64xf32>,
    return
  }
  func.func @transform_0(%arg0: i32) -> (i32, i32) {
    %c0_i32 = arith.constant 0 : i32
    %c0_i32_0 = arith.constant 0 : i32
    return %arg0, %c0_i32 : i32, i32
  }
  func.func @transform_1(%arg0: i32) -> (i32, i32) {
    %c0_i32 = arith.constant 0 : i32
    %c0_i32_0 = arith.constant 0 : i32
    %c0_i32_1 = arith.constant 0 : i32
    return %c0_i32, %c0_i32_0 : i32, i32
  }
  func.func @transform_2(%arg0: i32) -> (i32, i32) {
    %c0_i32 = arith.constant 0 : i32
    %c0_i32_0 = arith.constant 0 : i32
    %c0_i32_1 = arith.constant 0 : i32
    return %c0_i32, %c0_i32_0 : i32, i32
  }
  func.func @transform_3(%arg0: i32) -> (i32, i32) {
    %c0_i32 = arith.constant 0 : i32
    %c0_i32_0 = arith.constant 0 : i32
    %c0_i32_1 = arith.constant 0 : i32
    return %c0_i32, %c0_i32_0 : i32, i32
  }
  func.func @transform_4(%arg0: i32) -> (i32, i32) {
    %c0_i32 = arith.constant 0 : i32
    %c0_i32_0 = arith.constant 0 : i32
    %c0_i32_1 = arith.constant 0 : i32
    return %c0_i32, %c0_i32_0 : i32, i32
  }
  func.func @transform_5(%arg0: i32) -> (i32, i32) {
    %c0_i32 = arith.constant 0 : i32
    %c0_i32_0 = arith.constant 0 : i32
    return %arg0, %c0_i32 : i32, i32
  }
}

</mosaic_0001>

<bundles_post_ra>
// kernel: tpu_custom_call.1
= control target key start
LH: loop header
LB: loop body
LE: loop exit
PB: predicated region body
PF: predicated region fallthrough
CT: control target
= control target key end

     0   :  { %v424_v7 = vmov 0.0   ;;  %s630_s0 = inlined_call_operand.vmem [shape: f32[16,64], index: 0, kind: input, shape index: {}]   ;;  %s631_s1 = inlined_call_operand.vmem [shape: f32[64,256], index: 1, kind: input, shape index: {}]   ;;  %s632_s2 = inlined_call_operand.vmem [shape: f32[1,256], index: 2, kind: input, shape index: {}]   ;;  %s633_s3 = inlined_call_operand.vmem [shape: f32[256,64], index: 3, kind: input, shape index: {}]   ;;  %s634_s4 = inlined_call_operand.vmem [shape: f32[1,64], index: 4, kind: input, shape index: {}]   ;;  %s635_s5 = inlined_call_operand.hbm [shape: f32[16,64], index: 5, kind: output, shape index: {}]  }
   0x1   :  { %v24_v0 = vld [vmem:[%s631_s1 + $0x8] sm:$0xff]  ;;  %v26_v1 = vld [vmem:[%s631_s1 + $0x18] sm:$0xff]  ;;  %v23_v2 = vld [vmem:[%s631_s1] sm:$0xff]  ;;  %122 = vmatprep.mubr.f32.mxu0 %v424_v7 }
   0x2   :  { %v340_v3 = vpack.c.bf16 %v26_v1, %v24_v0  ;;  %v25_v4 = vld [vmem:[%s631_s1 + $0x10] sm:$0xff]  ;;  %v28_v5 = vld [vmem:[%s631_s1 + $0x28] sm:$0xff]  ;;  %v30_v6 = vld [vmem:[%s631_s1 + $0x38] sm:$0xff] }
   0x3   :  { %v342_v8 = vpack.c.bf16 %v25_v4, %v23_v2  ;;  %v344_v9 = vpack.c.bf16 %v30_v6, %v28_v5  ;;  %v27_v10 = vld [vmem:[%s631_s1 + $0x20] sm:$0xff]  ;;  %v29_v11 = vld [vmem:[%s631_s1 + $0x30] sm:$0xff]  ;;  %v32_v12 = vld [vmem:[%s631_s1 + $0x48] sm:$0xff] }
   0x4   :  { %341 = vmatprep.subr.bf16.mxu0 %v340_v3  ;;  %v34_v13 = vld [vmem:[%s631_s1 + $0x58] sm:$0xff]  ;;  %v346_v14 = vpack.c.bf16 %v29_v11, %v27_v10  ;;  %v31_v15 = vld [vmem:[%s631_s1 + $0x40] sm:$0xff]  ;;  %v33_v17 = vld [vmem:[%s631_s1 + $0x50] sm:$0xff] }
   0x5   :  { %343 = vmatpush1.bf16.msra.mxu0 %v342_v8  ;;  %v348_v16 = vpack.c.bf16 %v34_v13, %v32_v12  ;;  %v36_v18 = vld [vmem:[%s631_s1 + $0x68] sm:$0xff]  ;;  %v38_v19 = vld [vmem:[%s631_s1 + $0x78] sm:$0xff]  ;;  %v183_v20 = vld [vmem:[%s633_s3 + $0x80] sm:$0xff] }
   0x6   :  { %345 = vmatprep.subr.bf16.mxu0 %v344_v9  ;;  %v184_v21 = vld [vmem:[%s633_s3 + $0x88] sm:$0xff]  ;;  %v167_v22 = vld [vmem:[%s633_s3] sm:$0xff] }
   0x7   :  { %v356_v23 = vpack.c.bf16 %v184_v21, %v183_v20  ;;  %v168_v24 = vld [vmem:[%s633_s3 + $0x8] sm:$0xff] }
   0x8   :  { %10 = vsyncpa [#allocation3], 0  ;;  %v350_v25 = vpack.c.bf16 %v33_v17, %v31_v15  ;;  %v358_v26 = vpack.c.bf16 %v168_v24, %v167_v22  ;;  %v352_v27 = vpack.c.bf16 %v38_v19, %v36_v18  ;;  %v35_v28 = vld [vmem:[%s631_s1 + $0x60] sm:$0xff]  ;;  %v37_v29 = vld [vmem:[%s631_s1 + $0x70] sm:$0xff]  ;;  %vm51_vm0 = vcmask 523264   ;;  %s425_s15 = smov [#allocation2]  }
   0x9   :  { %347 = vmatpush1.bf16.msra.mxu0 %v346_v14  ;;  %357 = vmatprep.subr.bf16.mxu1 %v356_v23  ;;  %v354_v30 = vpack.c.bf16 %v37_v29, %v35_v28  ;;  %v21_v31 = vld [vmem:[%s630_s0] sm:$0xff]  ;;  %v22_v32 = vld [vmem:[%s630_s0 + $0x8] sm:$0xff]  ;;  %v185_v33 = vld [vmem:[%s633_s3 + $0x90] sm:$0xff]  ;;  %v41_v11 = vlaneseq  ;;  %s288_s16 = sshll.u32 %s425_s15, 4  ;;  %s289_s16 = int_to_ptr.vmem [resolvable:$true] %s288_s16 }
   0xa   :  { %349 = vmatprep.subr.bf16.mxu0 %v348_v16  ;;  %359 = vmatpush3.bf16.msra.mxu1 %v358_v26  ;;  %v186_v34 = vld [vmem:[%s633_s3 + $0x98] sm:$0xff]  ;;  %v169_v36 = vld [vmem:[%s633_s3 + $0x10] sm:$0xff]  ;;  %v187_v39 = vld [vmem:[%s633_s3 + $0xa0] sm:$0xff]  ;;  %s400_s17 = scalar_lea.vmem %s289_s16, 256  ;;  %p405_p1 = scmp.lt.s32.totalorder %s289_s16, %s289_s16 }
   0xb   :  { %v360_v35 = vpack.c.bf16 %v186_v34, %v185_v33  ;;  %v170_v37 = vld [vmem:[%s633_s3 + $0x18] sm:$0xff]  ;;  %v188_v40 = vld [vmem:[%s633_s3 + $0xa8] sm:$0xff]  ;;  %v171_v42 = vld [vmem:[%s633_s3 + $0x20] sm:$0xff]  ;;  %v42_v12 = vshrl.u32 %v41_v11, 7  ;;  %p401_p0 = scmp.ne.s32.totalorder %s289_s16, %s400_s17  ;;  %p406_p2 = scmp.lt.s32.totalorder %s400_s17, %s400_s17 }
   0xc   :  { %v362_v38 = vpack.c.bf16 %v170_v37, %v169_v36  ;;  %v364_v41 = vpack.c.bf16 %v188_v40, %v187_v39  ;;  %v172_v43 = vld [vmem:[%s633_s3 + $0x28] sm:$0xff]  ;;  %v189_v45 = vld [vmem:[%s633_s3 + $0xb0] sm:$0xff]  ;;  %v190_v46 = vld [vmem:[%s633_s3 + $0xb8] sm:$0xff] }
   0xd   :  { %351 = vmatpush1.bf16.msra.mxu0 %v350_v25  ;;  %361 = vmatprep.subr.bf16.mxu1 %v360_v35  ;;  %v366_v44 = vpack.c.bf16 %v172_v43, %v171_v42  ;;  %v368_v47 = vpack.c.bf16 %v190_v46, %v189_v45  ;;  %v173_v48 = vld [vmem:[%s633_s3 + $0x30] sm:$0xff]  ;;  %v174_v49 = vld [vmem:[%s633_s3 + $0x38] sm:$0xff]  ;;  %v191_v51 = vld [vmem:[%s633_s3 + $0xc0] sm:$0xff]  ;;  %v43_v13 = vsub.s32 0, %v42_v12  ;;  %v47_v15 = vsub.s32 1, %v42_v12  ;;  %p407_p3 = por %p406_p2, %p405_p1 }
   0xe   :  { %353 = vmatprep.subr.bf16.mxu0 %v352_v27  ;;  %363 = vmatpush3.bf16.msra.mxu1 %v362_v38  ;;  %v370_v50 = vpack.c.bf16 %v174_v49, %v173_v48  ;;  %v192_v52 = vld [vmem:[%s633_s3 + $0xc8] sm:$0xff]  ;;  %v175_v54 = vld [vmem:[%s633_s3 + $0x40] sm:$0xff]  ;;  %v193_v57 = vld [vmem:[%s633_s3 + $0xd0] sm:$0xff] }
   0xf   :  { %365 = vmatprep.subr.bf16.mxu1 %v364_v41  ;;  %v372_v53 = vpack.c.bf16 %v192_v52, %v191_v51  ;;  %v176_v55 = vld [vmem:[%s633_s3 + $0x48] sm:$0xff]  ;;  %v194_v58 = vld [vmem:[%s633_s3 + $0xd8] sm:$0xff]  ;;  %v177_v60 = vld [vmem:[%s633_s3 + $0x50] sm:$0xff]  ;;  %p408_p4 = pnand %p407_p3, %p401_p0 }
  0x10   :  { %v374_v56 = vpack.c.bf16 %v176_v55, %v175_v54  ;;  %v376_v59 = vpack.c.bf16 %v194_v58, %v193_v57  ;;  %v178_v61 = vld [vmem:[%s633_s3 + $0x58] sm:$0xff]  ;;  %v195_v63 = vld [vmem:[%s633_s3 + $0xe0] sm:$0xff]  ;;  %v196_v0 = vld [vmem:[%s633_s3 + $0xe8] sm:$0xff] }
  0x11   :  { %355 = vmatpush1.bf16.msra.mxu0 %v354_v30  ;;  %v378_v62 = vpack.c.bf16 %v178_v61, %v177_v60  ;;  %v179_v1 = vld [vmem:[%s633_s3 + $0x60] sm:$0xff]  ;;  %v380_v2 = vpack.c.bf16 %v196_v0, %v195_v63  ;;  %v180_v3 = vld [vmem:[%s633_s3 + $0x68] sm:$0xff]  ;;  %v197_v4 = vld [vmem:[%s633_s3 + $0xf0] sm:$0xff] }
  0x12   :  { %367 = vmatpush3.bf16.msra.mxu1 %v366_v44  ;;  %v198_v5 = vld [vmem:[%s633_s3 + $0xf8] sm:$0xff]  ;;  %v382_v6 = vpack.c.bf16 %v180_v3, %v179_v1  ;;  %v181_v8 = vld [vmem:[%s633_s3 + $0x70] sm:$0xff]  ;;  %v39_v14 = vld [vmem:[%s632_s2] sm:$0x3] }
  0x13   :  { %369 = vmatprep.subr.bf16.mxu1 %v368_v47  ;;  %v182_v9 = vld [vmem:[%s633_s3 + $0x78] sm:$0xff]  ;;  %v44_v16 = vrot.slane %v39_v14, %v43_v13  ;;  %v48_v17 = vrot.slane %v39_v14, %v47_v15 }
  0x14   :  { %299 = vmatmul.mubr.msk.f32.vlgmr.msra.gmra.mrb[0].mxu0 %vm51_vm0, %v21_v31  ;;  %v386_v10 = vpack.c.bf16 %v182_v9, %v181_v8 }
  0x15   :  { %128 = vmatprep.mubr.f32.mxu0 %v424_v7  ;;  %v384_v7 = vpack.c.bf16 %v198_v5, %v197_v4 }
  0x16   :  { %371 = vmatpush3.bf16.msra.mxu1 %v370_v50 }
  0x17   :  { %373 = vmatprep.subr.bf16.mxu1 %v372_v53 }
  0x18   :  { %300 = vmatmul.mubr.msk.f32.gmra.mrb[2].mxu0 %vm51_vm0, %v22_v32 }
  0x1a   :  { %375 = vmatpush3.bf16.msra.mxu1 %v374_v56 }
  0x1b   :  { %377 = vmatprep.subr.bf16.mxu1 %v376_v59  ;;  %v301_v59 = vld [vmem:[%s634_s4] ss:$0 sm:$0xff] }
  0x1e   :  { %379 = vmatpush3.bf16.msra.mxu1 %v378_v62 }
  0x1f   :  { %381 = vmatprep.subr.bf16.mxu1 %v380_v2 }
  0x22   :  { %383 = vmatpush3.bf16.msra.mxu1 %v382_v6 }
  0x23   :  { %385 = vmatprep.subr.bf16.mxu1 %v384_v7 }
  0x26   :  { %387 = vmatpush3.bf16.msra.mxu1 %v386_v10 }
  0xe7   :  { %v124_v18 = vpop.f32.mrb[0].mxu0 }
  0xe8   :  { %v125_v19 = vadd.f32 %v124_v18, %v44_v16  ;;  %v126_v20 = vpop.f32.mrb[1].mxu0 }
  0xe9   :  { %v127_v21 = vadd.f32 %v126_v20, %v48_v17 }
  0xea   :  { %v135_v22 = vmul.f32 %v125_v19, %v125_v19  ;;  %v151_v42 = vmul.f32 0.5, %v125_v19 }
  0xeb   :  { %v136_v23 = vmul.f32 %v127_v21, %v127_v21  ;;  %v130_v24 = vpop.f32.mrb[2].mxu0  ;;  %v152_v44 = vmul.f32 0.5, %v127_v21 }
  0xec   :  { %v139_v25 = vmul.f32 0.035677407, %v135_v22  ;;  %v131_v26 = vadd.f32 %v130_v24, %v44_v16  ;;  %v132_v27 = vpop.f32.mrb[3].mxu0 }
  0xed   :  { %v140_v28 = vmul.f32 0.035677407, %v136_v23  ;;  %v133_v29 = vadd.f32 %v132_v27, %v48_v17 }
  0xee   :  { %v143_v30 = vadd.f32 0.7978846, %v139_v25  ;;  %v137_v31 = vmul.f32 %v131_v26, %v131_v26  ;;  %v153_v48 = vmul.f32 0.5, %v131_v26 }
  0xef   :  { %v144_v32 = vadd.f32 0.7978846, %v140_v28  ;;  %v138_v33 = vmul.f32 %v133_v29, %v133_v29  ;;  %v154_v50 = vmul.f32 0.5, %v133_v29 }
  0xf0   :  { %v147_v34 = vmul.f32 %v143_v30, %v125_v19  ;;  %v141_v35 = vmul.f32 0.035677407, %v137_v31 }
  0xf1   :  { %v148_v36 = vmul.f32 %v144_v32, %v127_v21  ;;  %v142_v37 = vmul.f32 0.035677407, %v138_v33 }
  0xf2   :  { %392 = vtanh.f32 %v147_v34  ;;  %v145_v38 = vadd.f32 0.7978846, %v141_v35 }
  0xf3   :  { %394 = vtanh.f32 %v148_v36  ;;  %v146_v39 = vadd.f32 0.7978846, %v142_v37 }
  0xf4   :  { %v149_v40 = vmul.f32 %v145_v38, %v131_v26 }
  0xf5   :  { %v150_v41 = vmul.f32 %v146_v39, %v133_v29 }
  0xf6   :  { %396 = vtanh.f32 %v149_v40 }
  0xf7   :  { %398 = vtanh.f32 %v150_v41 }
  0xfc   :  { %v393_v43 = vpop.eup %392 }
  0xfd   :  { %v395_v45 = vpop.eup %394  ;;  %v159_v46 = vmul.f32 %v393_v43, %v151_v42 }
  0xfe   :  { %v160_v47 = vmul.f32 %v395_v45, %v152_v44 }
  0xff   :  { %v163_v53 = vadd.f32 %v159_v46, %v151_v42 }
 0x100   :  { %v397_v49 = vpop.eup %396  ;;  %v164_v51 = vadd.f32 %v160_v47, %v152_v44 }
 0x101   :  { %v399_v52 = vpop.eup %398  ;;  %v161_v54 = vmul.f32 %v397_v49, %v153_v48 }
 0x102   :  { %270 = vmatprep.mubr.f32.mxu1 %v164_v51  ;;  %v162_v55 = vmul.f32 %v399_v52, %v154_v50 }
 0x103   :  { %271 = vmatmul.mubr.f32.vlgmr.msra.gmra.mrb[0].mxu1 %v163_v53  ;;  %v165_v57 = vadd.f32 %v161_v54, %v153_v48 }
 0x104   :  { %v166_v56 = vadd.f32 %v162_v55, %v154_v50 }
 0x106   :  { %275 = vmatprep.mubr.f32.mxu1 %v166_v56 }
 0x107   :  { %276 = vmatmul.mubr.f32.gmra.mrb[2].mxu1 %v165_v57 }
 0x1d6   :  { %v334_v58 = vpop.f32.mrb[0].mxu1 }
 0x1d7   :  { %v335_v60 = vpop.f32.mrb[1].mxu1 }
 0x1d8   :  { %v336_v61 = vadd.f32 %v335_v60, %v334_v58 }
 0x1da   :  { %v273_v62 = vadd.f32 %v336_v61, %v301_v59  ;;  %v337_v63 = vpop.f32.mrb[2].mxu1 }
 0x1db   :  { %v338_v0 = vpop.f32.mrb[3].mxu1 }
 0x1dc   :  { %281 = vst.msk [vmem:[#allocation2] sm:$0xff] %vm51_vm0, %v273_v62  ;;  %v339_v1 = vadd.f32 %v338_v0, %v337_v63 }
 0x1de   :  { %v278_v2 = vadd.f32 %v339_v1, %v301_v59 }
 0x1e0   :  { %282 = vst.msk [vmem:[#allocation2 + $0x8] sm:$0xff] %vm51_vm0, %v278_v2 }
 0x1e1   :  { %411 = shalt.err (!%p408_p4)
}
 0x1e2   :  { %s412_s0 = scalar_lea.hbm %s635_s5, 256 }
 0x1e3   :  { %p413_p5 = scmp.ne.s32.totalorder %s635_s5, %s412_s0  ;;  %p416_p6 = scmp.lt.u32.totalorder %s412_s0, %s635_s5 }
 0x1e5   :  { %p418_p7 = pnand %p416_p6, %p413_p5 }
 0x1e7   :  { %421 = shalt.err (!%p418_p7)
}
 0x1e8   :  { %s426_s23 = smov 128   ;;  %s427_s24 = smov 8  }
 0x1e9   :  { %294 = dma.vmem_to_hbm [thread:$0]  %s289_s16, 256, %s635_s5, [#allocation3], %s426_s23, %s426_s23, %s427_s24  }
 0x1ea   :  { %422 = dma.done.wait [#allocation3], 256  }
 0x1eb   :  { %423 = vsyncadd [#allocation3], 4294967040 }
 0x1ec   :  { %298 = vsyncpa [#allocation3], 1 }

</bundles_post_ra>
